<compile_context>
chip_gen: v7x
topology: tpu7x:2x2x1
jax: 0.10.0
libtpu: 0.0.40
codegen_flags: <defaults>
</compile_context>

<pallas_src>
import jax
import jax.numpy as jnp
from jax import lax
from jax.experimental import pallas as pl
from jax.experimental.pallas import tpu as pltpu


def _bilinear_matrix(out_size, in_size, dtype=jnp.float32):
    """Interpolation matrix matching nn.Upsample(mode='bilinear', align_corners=False)."""
    scale = in_size / out_size
    dst = jnp.arange(out_size, dtype=jnp.float32)
    src = (dst + 0.5) * scale - 0.5
    src = jnp.maximum(src, 0.0)                       # PyTorch clamps negative src to 0
    i0 = jnp.minimum(jnp.floor(src).astype(jnp.int32), in_size - 1)
    i1 = jnp.minimum(i0 + 1, in_size - 1)
    lam1 = src - i0.astype(jnp.float32)
    lam0 = 1.0 - lam1
    rows = jnp.arange(out_size)
    r = jnp.zeros((out_size, in_size), dtype)
    r = r.at[rows, i0].add(lam0)
    r = r.at[rows, i1].add(lam1)
    return r


def _im2col_3x3_padded(x, k_pad=16):
    """x: (N,1,H,W) -> (N, k_pad, H*W).

    Rows 0..8 = 3x3 taps (dh outer, dw inner, matching weight.reshape(C,9)),
    row 9 = ones (bias row), rows 10..k_pad-1 = zeros (sublane padding).
    """
    N, _, H, W = x.shape
    xp = jnp.pad(x[:, 0], ((0, 0), (1, 1), (1, 1)))
    taps = [xp[:, dh:dh + H, dw:dw + W] for dh in range(3) for dw in range(3)]
    p = jnp.stack(taps, axis=1).reshape(N, 9, H * W)
    ones = jnp.ones((N, 1, H * W), p.dtype)
    zeros = jnp.zeros((N, k_pad - 10, H * W), p.dtype)
    return jnp.concatenate([p, ones, zeros], axis=1)


def _conv_upsample_kernel(w_ref, p_ref, rt_ref, out_ref):
    # Conv2d(1,C,3,pad=1) over the whole (stacked) batch as one im2col matmul;
    # bias is already folded in via the ones row / bias column.  (N*C, H*W) f32.
    featT = jnp.dot(w_ref[...], p_ref[...], preferred_element_type=jnp.float32)
    # Fused separable bilinear interpolation: one matmul against kron(rh, rw)^T.
    # K = H*W = 256 (full contraction depth), N = Ho*Wo = 768 (6x128 lane-dense).
    out = jnp.dot(featT.astype(rt_ref.dtype), rt_ref[...],
                  preferred_element_type=jnp.float32)                 # (N*C, Ho*Wo)
    out_ref[...] = out.astype(out_ref.dtype)


def upsample_model_forward(x, weight, bias, height, width):
    """x: (N,1,H,W), weight: (C,1,3,3), bias: (C,) -> bf16 (N, C, height, width)."""
    N, _, H, W = x.shape
    C = weight.shape[0]
    Ho, Wo = height, width
    K = 16                                             # padded per-batch contraction depth

    # Batch-stacked patches along sublanes: (N*K, H*W) bf16.
    p_stacked = _im2col_3x3_padded(x, K).reshape(N * K, H * W).astype(jnp.bfloat16)

    # Conv weight with bias column folded in, block-diagonal over the batch so the
    # whole batch is one (N*C, N*K) @ (N*K, H*W) matmul (row n*C+c = batch n, chan c).
    w_ext = jnp.concatenate(
        [weight.reshape(C, 9).astype(jnp.float32),
         bias.reshape(C, 1).astype(jnp.float32),
         jnp.zeros((C, K - 10), jnp.float32)], axis=1)                # (C, K)
    w_blk = jnp.kron(jnp.eye(N, dtype=jnp.float32), w_ext).astype(jnp.bfloat16)  # (N*C, N*K)

    # Fused interpolation matrix: R[oh*Wo+ow, h*W+w] = rh[oh,h] * rw[ow,w]; pass R^T.
    rh = _bilinear_matrix(Ho, H)                                      # (Ho, H)
    rw = _bilinear_matrix(Wo, W)                                      # (Wo, W)
    rt = jnp.kron(rh, rw).T.astype(jnp.bfloat16)                      # (H*W, Ho*Wo)

    out = pl.pallas_call(
        _conv_upsample_kernel,
        out_shape=jax.ShapeDtypeStruct((N * C, Ho * Wo), jnp.bfloat16),
        in_specs=[
            pl.BlockSpec(memory_space=pltpu.MemorySpace.VMEM),        # w_blk  (96, 32)
            pl.BlockSpec(memory_space=pltpu.MemorySpace.VMEM),        # p      (32, 256)
            pl.BlockSpec(memory_space=pltpu.MemorySpace.VMEM),        # rt     (256, 768)
        ],
        out_specs=pl.BlockSpec(memory_space=pltpu.MemorySpace.VMEM),  # out    (96, 768)
    )(w_blk, p_stacked, rt)

    # Rows are already (batch-major, channel) NCHW order: reshape only, no transpose.
    return out.reshape(N, C, Ho, Wo)


def reference_forward(x, weight, bias, height, width):
    """Plain-JAX f32 reference: lax conv + dense bilinear-matrix upsample."""
    y = lax.conv_general_dilated(
        x.astype(jnp.float32), weight.astype(jnp.float32),
        window_strides=(1, 1), padding=((1, 1), (1, 1)),
        dimension_numbers=("NCHW", "OIHW", "NCHW"),
    ) + bias.reshape(1, -1, 1, 1)
    rh = _bilinear_matrix(height, x.shape[2])
    rw = _bilinear_matrix(width, x.shape[3])
    return jnp.einsum("oh,nchw,pw->ncop", rh, y, rw)


if __name__ == "__main__":
    key = jax.random.PRNGKey(0)
    N, Cin, H, W = 2, 1, 16, 16
    height, width = 32, 24
    Cout, Kk = 48, 3

    k1, k2, k3 = jax.random.split(key, 3)
    fan_in = Cin * Kk * Kk
    bound = 1.0 / (fan_in ** 0.5)            # mimic PyTorch Conv2d default init
    weight = jax.random.uniform(k1, (Cout, Cin, Kk, Kk), jnp.float32, -bound, bound)
    bias = jax.random.uniform(k2, (Cout,), jnp.float32, -bound, bound)
    x = jax.random.normal(k3, (N, Cin, H, W), jnp.float32)

    out = jax.block_until_ready(upsample_model_forward(x, weight, bias, height, width))
    ref = reference_forward(x, weight, bias, height, width)

    assert out.shape == (N, Cout, height, width), out.shape
    # bf16 MXU inputs + bf16 output vs an f32 reference -> bf16-scale tolerance.
    err = float(jnp.max(jnp.abs(out.astype(jnp.float32) - ref)))
    assert jnp.allclose(out.astype(jnp.float32), ref, rtol=2e-2, atol=2e-2), err
    print("KERNEL_OK")
</pallas_src>

<mosaic_0001>
module attributes {stable_mosaic.version = 11 : i64} {
  func.func @_conv_upsample_kernel(%arg0: memref<96x32xbf16, #tpu.memory_space<vmem>>, %arg1: memref<32x256xbf16, #tpu.memory_space<vmem>>, %arg2: memref<256x768xbf16, #tpu.memory_space<vmem>>, %arg3: memref<96x768xbf16, #tpu.memory_space<vmem>>) attributes {dimension_semantics = [], scalar_prefetch = 0 : i64, scratch_operands = 0 : i64, tpu.core_type = #tpu.core_type<tc>} {
    %c0 = arith.constant 0 : index
    %c0_0 = arith.constant 0 : index
    %0 = vector.load %arg0[%c0, %c0_0] : memref<96x32xbf16, #tpu.memory_space<vmem>>, vector<96x32xbf16>
    %c0_1 = arith.constant 0 : index
    %c0_2 = arith.constant 0 : index
    %1 = vector.load %arg1[%c0_1, %c0_2] : memref<32x256xbf16, #tpu.memory_space<vmem>>, vector<32x256xbf16>
    %cst = arith.constant dense<0.000000e+00> : vector<96x256xf32>
    %2 = tpu.matmul %0, %1, %cst {dimension_numbers = #tpu.dot_dimension_numbers<[1], [0], [0], [1], [0, 0, 1, 1], [], []>} : vector<96x32xbf16>, vector<32x256xbf16>, vector<96x256xf32> -> vector<96x256xf32>
    %3 = arith.truncf %2 : vector<96x256xf32> to vector<96x256xbf16>
    %c0_3 = arith.constant 0 : index
    %c0_4 = arith.constant 0 : index
    %4 = vector.load %arg2[%c0_3, %c0_4] : memref<256x768xbf16, #tpu.memory_space<vmem>>, vector<256x768xbf16>
    %cst_5 = arith.constant dense<0.000000e+00> : vector<96x768xf32>
    %5 = tpu.matmul %3, %4, %cst_5 {dimension_numbers = #tpu.dot_dimension_numbers<[1], [0], [0], [1], [0, 0, 1, 1], [], []>} : vector<96x256xbf16>, vector<256x768xbf16>, vector<96x768xf32> -> vector<96x768xf32>
    %6 = arith.truncf %5 : vector<96x768xf32> to vector<96x768xbf16>
    %c0_6 = arith.constant 0 : index
    %c0_7 = arith.constant 0 : index
    %7 = vector.load %arg3[%c0_6, %c0_7] : memref<96x768xbf16, #tpu.memory_space<vmem>>, vector<96x768xbf16>
    tpu.vector_store %arg3[%c0_6, %c0_7], %6 {strides = array<i32>} : memref<96x768xbf16, #tpu.memory_space<vmem>>, vector<96x768xbf16>,
    return
  }
}

</mosaic_0001>

<bundles_post_ra>
// kernel: tpu_custom_call.1
= control target key start
LH: loop header
LB: loop body
LE: loop exit
PB: predicated region body
PF: predicated region fallthrough
CT: control target
= control target key end

     0   :  { %8 = vsyncpa [#allocation3], 0  ;;  %s1916_s0 = inlined_call_operand.vmem [shape: bf16[96,32], index: 0, kind: input, shape index: {}]   ;;  %s1917_s1 = inlined_call_operand.vmem [shape: bf16[32,256], index: 1, kind: input, shape index: {}]   ;;  %s1918_s2 = inlined_call_operand.hbm [shape: bf16[256,768], index: 2, kind: input, shape index: {}]   ;;  %s1919_s3 = inlined_call_operand.hbm [shape: bf16[96,768], index: 3, kind: output, shape index: {}]  }
   0x1   :  { %9 = vsyncpa [#allocation4], 0  ;;  %s1769_s12 = smov [#allocation2]   ;;  %s1721_s16 = scalar_lea.hbm %s1918_s2, 12288 }
   0x2   :  { %s19_s13 = sshll.u32 %s1769_s12, 4  ;;  %p1722_p0 = scmp.ne.s32.totalorder %s1918_s2, %s1721_s16  ;;  %s20_s13 = int_to_ptr.vmem [resolvable:$true] %s19_s13 }
   0x3   :  { %p1725_p1 = scmp.lt.u32.totalorder %s1721_s16, %s1918_s2 }
   0x5   :  { %p1727_p2 = pnand %p1725_p1, %p1722_p0 }
   0x7   :  { %1730 = shalt.err (!%p1727_p2)
}
   0x8   :  { %s1731_s21 = scalar_lea.vmem %s20_s13, 12288  ;;  %p1736_p4 = scmp.lt.s32.totalorder %s20_s13, %s20_s13 }
   0x9   :  { %p1732_p3 = scmp.ne.s32.totalorder %s20_s13, %s1731_s21  ;;  %p1737_p5 = scmp.lt.s32.totalorder %s1731_s21, %s1731_s21 }
   0xb   :  { %p1738_p6 = por %p1737_p5, %p1736_p4 }
   0xd   :  { %p1739_p7 = pnand %p1738_p6, %p1732_p3 }
   0xf   :  { %1742 = shalt.err (!%p1739_p7)
}
  0x10   :  { %s1770_s22 = smov 384   ;;  %s1771_s23 = smov 24  }
  0x11   :  { %25 = dma.hbm_to_vmem [thread:$0]  %s1918_s2, 12288, %s20_s13, [#allocation3], %s1770_s22, %s1770_s22, %s1771_s23  }
  0x12   :  { %1765 = dma.done.wait [#allocation3], 12288  }
  0x13   :  { %1766 = vsyncadd [#allocation3], 4294955008  ;;  %v1772_v0 = vmov 0   ;;  %v1565_v1 = vld [vmem:[%s1917_s1 + $0x4] ss:$8 sps:$4 sm:$0xff]   ;;  %vm96_vm0 = vcmask 261120  }
  0x14   :  { %147 = vmatprep.mubr.bf16.mxu0 %v1772_v0  ;;  %v1567_v2 = vld [vmem:[%s1917_s1] ss:$8 sps:$4 sm:$0xff]   ;;  %115 = vmatprep.subr.bf16.mxu0 %v1565_v1  ;;  %v1568_v3 = vld [vmem:[%s1917_s1 + $0x14] ss:$8 sps:$4 sm:$0xff]   ;;  %v1570_v4 = vld [vmem:[%s1917_s1 + $0x10] ss:$8 sps:$4 sm:$0xff]  }
  0x15   :  { %116 = vmatpush1.bf16.msra.mxu0 %v1567_v2  ;;  %v1571_v5 = vld [vmem:[%s1916_s0] sm:$0xff]   ;;  %v1577_v6 = vld [vmem:[#allocation2 + $0x4] ss:$24 sps:$4 sm:$0xff]   ;;  %v1579_v7 = vld [vmem:[#allocation2 + $0x8] ss:$24 sps:$4 sm:$0xff]  }
  0x16   :  { %117 = vmatprep.subr.bf16.mxu0 %v1568_v3  ;;  %v1581_v8 = vld [vmem:[#allocation2 + $0xc] ss:$24 sps:$4 sm:$0xff]   ;;  %796 = vmatprep.subr.bf16.mxu1 %v1577_v6  ;;  %v1582_v9 = vld [vmem:[#allocation2] ss:$24 sps:$4 sm:$0xff]   ;;  %v1587_v13 = vld [vmem:[#allocation2 + $0x3c] ss:$24 sps:$4 sm:$0xff]  }
  0x17   :  { %v1572_v10 = vld [vmem:[%s1916_s0 + $0x8] sm:$0xff]   ;;  %v1583_v11 = vld [vmem:[#allocation2 + $0x34] ss:$24 sps:$4 sm:$0xff]   ;;  %797 = vmatpush1.bf16.msra.mxu1 %v1582_v9  ;;  %v1588_v14 = vld [vmem:[#allocation2 + $0x30] ss:$24 sps:$4 sm:$0xff]  }
  0x18   :  { %v1585_v12 = vld [vmem:[#allocation2 + $0x38] ss:$24 sps:$4 sm:$0xff]   ;;  %798 = vmatprep.subr.bf16.mxu1 %v1583_v11  ;;  %v1589_v15 = vld [vmem:[#allocation2 + $0x64] ss:$24 sps:$4 sm:$0xff]   ;;  %v1591_v16 = vld [vmem:[#allocation2 + $0x68] ss:$24 sps:$4 sm:$0xff]  }
  0x19   :  { %118 = vmatpush1.bf16.msra.mxu0 %v1570_v4  ;;  %v1593_v17 = vld [vmem:[#allocation2 + $0x6c] ss:$24 sps:$4 sm:$0xff]   ;;  %v1594_v18 = vld [vmem:[#allocation2 + $0x60] ss:$24 sps:$4 sm:$0xff]   ;;  %v1599_v20 = vld [vmem:[#allocation2 + $0x9c] ss:$24 sps:$4 sm:$0xff]  }
  0x1a   :  { %889 = vmatprep.subr.bf16.mxu0 %v1581_v8  ;;  %v1595_v19 = vld [vmem:[#allocation2 + $0x94] ss:$24 sps:$4 sm:$0xff]   ;;  %v1573_v21 = vld [vmem:[%s1916_s0 + $0x10] sm:$0xff]   ;;  %v1597_v22 = vld [vmem:[#allocation2 + $0x98] ss:$24 sps:$4 sm:$0xff]  }
  0x1b   :  { %799 = vmatpush1.bf16.msra.mxu1 %v1588_v14  ;;  %v1600_v23 = vld [vmem:[#allocation2 + $0x90] ss:$24 sps:$4 sm:$0xff]   ;;  %v1601_v24 = vld [vmem:[#allocation2 + $0xc4] ss:$24 sps:$4 sm:$0xff]   ;;  %v1606_v27 = vld [vmem:[#allocation2 + $0xc0] ss:$24 sps:$4 sm:$0xff]  }
  0x1c   :  { %1354 = vmatmul.mubr.msk.bf16.vlgmr.msra.gmra.mrb[0].mxu0 %vm96_vm0, %v1571_v5  ;;  %800 = vmatprep.subr.bf16.mxu1 %v1589_v15  ;;  %v1605_v25 = vld [vmem:[#allocation2 + $0xcc] ss:$24 sps:$4 sm:$0xff]   ;;  %v1603_v26 = vld [vmem:[#allocation2 + $0xc8] ss:$24 sps:$4 sm:$0xff]   ;;  %v1611_v29 = vld [vmem:[#allocation2 + $0xfc] ss:$24 sps:$4 sm:$0xff]  }
  0x1d   :  { %157 = vmatprep.mubr.bf16.mxu0 %v1772_v0  ;;  %890 = vmatpush1.bf16.msra.mxu0 %v1579_v7  ;;  %v1607_v28 = vld [vmem:[#allocation2 + $0xf4] ss:$24 sps:$4 sm:$0xff]   ;;  %v1609_v31 = vld [vmem:[#allocation2 + $0xf8] ss:$24 sps:$4 sm:$0xff]   ;;  %v1613_v33 = vld [vmem:[#allocation2 + $0x124] ss:$24 sps:$4 sm:$0xff]  }
  0x1e   :  { %891 = vmatprep.subr.bf16.mxu0 %v1587_v13  ;;  %v1574_v30 = vld [vmem:[%s1916_s0 + $0x18] sm:$0xff]   ;;  %v1618_v36 = vld [vmem:[#allocation2 + $0x120] ss:$24 sps:$4 sm:$0xff]   ;;  %v1623_v38 = vld [vmem:[#allocation2 + $0x15c] ss:$24 sps:$4 sm:$0xff]  }
  0x1f   :  { %801 = vmatpush1.bf16.msra.mxu1 %v1594_v18  ;;  %v1612_v32 = vld [vmem:[#allocation2 + $0xf0] ss:$24 sps:$4 sm:$0xff]   ;;  %v1617_v34 = vld [vmem:[#allocation2 + $0x12c] ss:$24 sps:$4 sm:$0xff]   ;;  %v1630_v45 = vld [vmem:[#allocation2 + $0x180] ss:$24 sps:$4 sm:$0xff]  }
  0x20   :  { %802 = vmatprep.subr.bf16.mxu1 %v1595_v19  ;;  %v1615_v35 = vld [vmem:[#allocation2 + $0x128] ss:$24 sps:$4 sm:$0xff]   ;;  %v1619_v37 = vld [vmem:[#allocation2 + $0x154] ss:$24 sps:$4 sm:$0xff]   ;;  %v1621_v40 = vld [vmem:[#allocation2 + $0x158] ss:$24 sps:$4 sm:$0xff]  }
  0x21   :  { %892 = vmatpush1.bf16.msra.mxu0 %v1585_v12  ;;  %v1575_v39 = vld [vmem:[%s1916_s0 + $0x20] sm:$0xff]   ;;  %v1625_v42 = vld [vmem:[#allocation2 + $0x184] ss:$24 sps:$4 sm:$0xff]   ;;  %v1627_v44 = vld [vmem:[#allocation2 + $0x188] ss:$24 sps:$4 sm:$0xff]  }
  0x22   :  { %893 = vmatprep.subr.bf16.mxu0 %v1593_v17  ;;  %v1624_v41 = vld [vmem:[#allocation2 + $0x150] ss:$24 sps:$4 sm:$0xff]   ;;  %v1629_v43 = vld [vmem:[#allocation2 + $0x18c] ss:$24 sps:$4 sm:$0xff]   ;;  %v1635_v47 = vld [vmem:[#allocation2 + $0x1bc] ss:$24 sps:$4 sm:$0xff]  }
  0x23   :  { %803 = vmatpush1.bf16.msra.mxu1 %v1600_v23  ;;  %v1631_v46 = vld [vmem:[#allocation2 + $0x1b4] ss:$24 sps:$4 sm:$0xff]   ;;  %v1576_v48 = vld [vmem:[%s1916_s0 + $0x28] sm:$0xff]   ;;  %v1636_v50 = vld [vmem:[#allocation2 + $0x1b0] ss:$24 sps:$4 sm:$0xff]   ;;  %s1773_s0 = smov [#allocation5]  }
  0x24   :  { %1355 = vmatmul.mubr.msk.bf16.gmra.mrb[4].mxu0 %vm96_vm0, %v1572_v10  ;;  %804 = vmatprep.subr.bf16.mxu1 %v1601_v24  ;;  %v1633_v49 = vld [vmem:[#allocation2 + $0x1b8] ss:$24 sps:$4 sm:$0xff]   ;;  %v1637_v51 = vld [vmem:[#allocation2 + $0x1e4] ss:$24 sps:$4 sm:$0xff]   ;;  %v1639_v53 = vld [vmem:[#allocation2 + $0x1e8] ss:$24 sps:$4 sm:$0xff]  }
  0x25   :  { %167 = vmatprep.mubr.bf16.mxu0 %v1772_v0  ;;  %894 = vmatpush1.bf16.msra.mxu0 %v1591_v16  ;;  %v1641_v52 = vld [vmem:[#allocation2 + $0x1ec] ss:$24 sps:$4 sm:$0xff]   ;;  %v1642_v54 = vld [vmem:[#allocation2 + $0x1e0] ss:$24 sps:$4 sm:$0xff]   ;;  %v1647_v56 = vld [vmem:[#allocation2 + $0x21c] ss:$24 sps:$4 sm:$0xff]  }
  0x26   :  { %895 = vmatprep.subr.bf16.mxu0 %v1599_v20  ;;  %v1643_v55 = vld [vmem:[#allocation2 + $0x214] ss:$24 sps:$4 sm:$0xff]   ;;  %v1645_v57 = vld [vmem:[#allocation2 + $0x218] ss:$24 sps:$4 sm:$0xff]   ;;  %v1649_v59 = vld [vmem:[#allocation2 + $0x244] ss:$24 sps:$4 sm:$0xff]  }
  0x27   :  { %805 = vmatpush1.bf16.msra.mxu1 %v1606_v27  ;;  %v1648_v58 = vld [vmem:[#allocation2 + $0x210] ss:$24 sps:$4 sm:$0xff]   ;;  %v1653_v60 = vld [vmem:[#allocation2 + $0x24c] ss:$24 sps:$4 sm:$0xff]   ;;  %v1654_v62 = vld [vmem:[#allocation2 + $0x240] ss:$24 sps:$4 sm:$0xff]  }
  0x28   :  { %806 = vmatprep.subr.bf16.mxu1 %v1607_v28  ;;  %v1651_v61 = vld [vmem:[#allocation2 + $0x248] ss:$24 sps:$4 sm:$0xff]   ;;  %v1655_v63 = vld [vmem:[#allocation2 + $0x274] ss:$24 sps:$4 sm:$0xff]   ;;  %v1657_v1 = vld [vmem:[#allocation2 + $0x278] ss:$24 sps:$4 sm:$0xff]  }
  0x29   :  { %896 = vmatpush1.bf16.msra.mxu0 %v1597_v22  ;;  %v1660_v2 = vld [vmem:[#allocation2 + $0x270] ss:$24 sps:$4 sm:$0xff]   ;;  %v1661_v3 = vld [vmem:[#allocation2 + $0x2a4] ss:$24 sps:$4 sm:$0xff]   ;;  %v1666_v6 = vld [vmem:[#allocation2 + $0x2a0] ss:$24 sps:$4 sm:$0xff]  }
  0x2a   :  { %897 = vmatprep.subr.bf16.mxu0 %v1605_v25  ;;  %v1665_v4 = vld [vmem:[#allocation2 + $0x2ac] ss:$24 sps:$4 sm:$0xff]   ;;  %v1663_v5 = vld [vmem:[#allocation2 + $0x2a8] ss:$24 sps:$4 sm:$0xff]   ;;  %v1671_v8 = vld [vmem:[#allocation2 + $0x2dc] ss:$24 sps:$4 sm:$0xff]  }
  0x2b   :  { %807 = vmatpush1.bf16.msra.mxu1 %v1612_v32  ;;  %v1667_v7 = vld [vmem:[#allocation2 + $0x2d4] ss:$24 sps:$4 sm:$0xff]   ;;  %v1669_v9 = vld [vmem:[#allocation2 + $0x2d8] ss:$24 sps:$4 sm:$0xff]   ;;  %v1678_v19 = vld [vmem:[#allocation2 + $0x44] ss:$24 sps:$4 sm:$0xff]  }
  0x2c   :  { %1356 = vmatmul.mubr.msk.bf16.gmra.mrb[8].mxu0 %vm96_vm0, %v1573_v21  ;;  %808 = vmatprep.subr.bf16.mxu1 %v1613_v33  ;;  %v1672_v10 = vld [vmem:[#allocation2 + $0x2d0] ss:$24 sps:$4 sm:$0xff]   ;;  %v1675_v11 = vld [vmem:[#allocation2 + $0x14] ss:$24 sps:$4 sm:$0xff]   ;;  %v1676_v21 = vld [vmem:[#allocation2 + $0x40] ss:$24 sps:$4 sm:$0xff]  }
  0x2d   :  { %177 = vmatprep.mubr.bf16.mxu0 %v1772_v0  ;;  %898 = vmatpush1.bf16.msra.mxu0 %v1603_v26  ;;  %v1673_v18 = vld [vmem:[#allocation2 + $0x10] ss:$24 sps:$4 sm:$0xff]   ;;  %v1681_v23 = vld [vmem:[#allocation2 + $0x74] ss:$24 sps:$4 sm:$0xff]   ;;  %s1332_s17 = sshll.u32 %s1773_s0, 4  ;;  %s1333_s17 = int_to_ptr.vmem [resolvable:$true] %s1332_s17 }
  0x2e   :  { %899 = vmatprep.subr.bf16.mxu0 %v1611_v29  ;;  %v1679_v28 = vld [vmem:[#allocation2 + $0x70] ss:$24 sps:$4 sm:$0xff]   ;;  %v1684_v29 = vld [vmem:[#allocation2 + $0xa4] ss:$24 sps:$4 sm:$0xff]   ;;  %v1687_v33 = vld [vmem:[#allocation2 + $0xd4] ss:$24 sps:$4 sm:$0xff]   ;;  %p1748_p9 = scmp.lt.s32.totalorder %s1333_s17, %s1333_s17 }
  0x2f   :  { %809 = vmatpush1.bf16.msra.mxu1 %v1618_v36  ;;  %s1743_s18 = scalar_lea.vmem %s1333_s17, 4608 }
  0x30   :  { %810 = vmatprep.subr.bf16.mxu1 %v1619_v37  ;;  %p1744_p8 = scmp.ne.s32.totalorder %s1333_s17, %s1743_s18  ;;  %p1749_p10 = scmp.lt.s32.totalorder %s1743_s18, %s1743_s18 }
  0x31   :  { %900 = vmatpush1.bf16.msra.mxu0 %v1609_v31  ;;  %v1682_v31 = vld [vmem:[#allocation2 + $0xa0] ss:$24 sps:$4 sm:$0xff]  }
  0x32   :  { %901 = vmatprep.subr.bf16.mxu0 %v1617_v34  ;;  %p1750_p11 = por %p1749_p10, %p1748_p9 }
  0x33   :  { %811 = vmatpush1.bf16.msra.mxu1 %v1624_v41  ;;  %v1688_v41 = vld [vmem:[#allocation2 + $0x100] ss:$24 sps:$4 sm:$0xff]  }
  0x34   :  { %1357 = vmatmul.mubr.msk.bf16.gmra.mrb[12].mxu0 %vm96_vm0, %v1574_v30  ;;  %812 = vmatprep.subr.bf16.mxu1 %v1625_v42  ;;  %p1751_p12 = pnand %p1750_p11, %p1744_p8 }
  0x35   :  { %187 = vmatprep.mubr.bf16.mxu0 %v1772_v0  ;;  %902 = vmatpush1.bf16.msra.mxu0 %v1615_v35 }
  0x36   :  { %903 = vmatprep.subr.bf16.mxu0 %v1623_v38  ;;  %v1685_v38 = vld [vmem:[#allocation2 + $0xd0] ss:$24 sps:$4 sm:$0xff]  }
  0x37   :  { %813 = vmatpush1.bf16.msra.mxu1 %v1630_v45 }
  0x38   :  { %814 = vmatprep.subr.bf16.mxu1 %v1631_v46 }
  0x39   :  { %904 = vmatpush1.bf16.msra.mxu0 %v1621_v40 }
  0x3a   :  { %905 = vmatprep.subr.bf16.mxu0 %v1629_v43  ;;  %v1693_v43 = vld [vmem:[#allocation2 + $0x134] ss:$24 sps:$4 sm:$0xff]  }
  0x3b   :  { %815 = vmatpush1.bf16.msra.mxu1 %v1636_v50 }
  0x3c   :  { %1358 = vmatmul.mubr.msk.bf16.gmra.mrb[16].mxu0 %vm96_vm0, %v1575_v39  ;;  %816 = vmatprep.subr.bf16.mxu1 %v1637_v51  ;;  %v1690_v39 = vld [vmem:[#allocation2 + $0x104] ss:$24 sps:$4 sm:$0xff]   ;;  %v1694_v51 = vld [vmem:[#allocation2 + $0x160] ss:$24 sps:$4 sm:$0xff]  }
  0x3d   :  { %197 = vmatprep.mubr.bf16.mxu0 %v1772_v0  ;;  %906 = vmatpush1.bf16.msra.mxu0 %v1627_v44  ;;  %v1659_v0 = vld [vmem:[#allocation2 + $0x27c] ss:$24 sps:$4 sm:$0xff]  }
  0x3e   :  { %907 = vmatprep.subr.bf16.mxu0 %v1635_v47 }
  0x3f   :  { %817 = vmatpush1.bf16.msra.mxu1 %v1642_v54 }
  0x40   :  { %818 = vmatprep.subr.bf16.mxu1 %v1643_v55 }
  0x41   :  { %908 = vmatpush1.bf16.msra.mxu0 %v1633_v49  ;;  %v1696_v49 = vld [vmem:[#allocation2 + $0x164] ss:$24 sps:$4 sm:$0xff]  }
  0x42   :  { %909 = vmatprep.subr.bf16.mxu0 %v1641_v52 }
  0x43   :  { %819 = vmatpush1.bf16.msra.mxu1 %v1648_v58  ;;  %v1697_v58 = vld [vmem:[#allocation2 + $0x190] ss:$24 sps:$4 sm:$0xff]  }
  0x44   :  { %1359 = vmatmul.mubr.msk.bf16.gmra.mrb[20].mxu0 %vm96_vm0, %v1576_v48  ;;  %820 = vmatprep.subr.bf16.mxu1 %v1649_v59  ;;  %v1691_v48 = vld [vmem:[#allocation2 + $0x130] ss:$24 sps:$4 sm:$0xff]   ;;  %v1702_v59 = vld [vmem:[#allocation2 + $0x1c4] ss:$24 sps:$4 sm:$0xff]  }
  0x45   :  { %910 = vmatpush1.bf16.msra.mxu0 %v1639_v53  ;;  %v1699_v53 = vld [vmem:[#allocation2 + $0x194] ss:$24 sps:$4 sm:$0xff]  }
  0x46   :  { %911 = vmatprep.subr.bf16.mxu0 %v1647_v56 }
  0x47   :  { %821 = vmatpush1.bf16.msra.mxu1 %v1654_v62 }
  0x48   :  { %822 = vmatprep.subr.bf16.mxu1 %v1655_v63  ;;  %v1705_v63 = vld [vmem:[#allocation2 + $0x1f4] ss:$24 sps:$4 sm:$0xff]  }
  0x49   :  { %912 = vmatpush1.bf16.msra.mxu0 %v1645_v57 }
  0x4a   :  { %913 = vmatprep.subr.bf16.mxu0 %v1653_v60 }
  0x4b   :  { %823 = vmatpush1.bf16.msra.mxu1 %v1660_v2 }
  0x4c   :  { %824 = vmatprep.subr.bf16.mxu1 %v1661_v3 }
  0x4d   :  { %914 = vmatpush1.bf16.msra.mxu0 %v1651_v61  ;;  %v1700_v61 = vld [vmem:[#allocation2 + $0x1c0] ss:$24 sps:$4 sm:$0xff]  }
  0x4e   :  { %915 = vmatprep.subr.bf16.mxu0 %v1659_v0 }
  0x4f   :  { %825 = vmatpush1.bf16.msra.mxu1 %v1666_v6  ;;  %v1706_v6 = vld [vmem:[#allocation2 + $0x220] ss:$24 sps:$4 sm:$0xff]  }
  0x50   :  { %826 = vmatprep.subr.bf16.mxu1 %v1667_v7  ;;  %v1711_v7 = vld [vmem:[#allocation2 + $0x254] ss:$24 sps:$4 sm:$0xff]  }
  0x51   :  { %916 = vmatpush1.bf16.msra.mxu0 %v1657_v1 }
  0x52   :  { %917 = vmatprep.subr.bf16.mxu0 %v1665_v4  ;;  %v1703_v4 = vld [vmem:[#allocation2 + $0x1f0] ss:$24 sps:$4 sm:$0xff]  }
  0x53   :  { %827 = vmatpush1.bf16.msra.mxu1 %v1672_v10  ;;  %v1712_v10 = vld [vmem:[#allocation2 + $0x280] ss:$24 sps:$4 sm:$0xff]  }
  0x54   :  { %1528 = vmatprep.subr.bf16.mxu1 %v1675_v11 }
  0x55   :  { %918 = vmatpush1.bf16.msra.mxu0 %v1663_v5  ;;  %v1708_v5 = vld [vmem:[#allocation2 + $0x224] ss:$24 sps:$4 sm:$0xff]  }
  0x56   :  { %919 = vmatprep.subr.bf16.mxu0 %v1671_v8  ;;  %v1709_v8 = vld [vmem:[#allocation2 + $0x250] ss:$24 sps:$4 sm:$0xff]  }
  0x59   :  { %920 = vmatpush1.bf16.msra.mxu0 %v1669_v9  ;;  %v1714_v9 = vld [vmem:[#allocation2 + $0x284] ss:$24 sps:$4 sm:$0xff]  }
  0x5a   :  { %982 = vmatprep.subr.bf16.mxu0 %v1675_v11  ;;  %v1717_v11 = vld [vmem:[#allocation2 + $0x2b4] ss:$24 sps:$4 sm:$0xff]  }
  0xef   :  { %v149_v12 = vpop.f32.mrb[0].mxu0 }
  0xf0   :  { %v151_v13 = vpop.f32.mrb[1].mxu0 }
  0xf1   :  { %v153_v14 = vpop.f32.mrb[2].mxu0 }
  0xf2   :  { %v1851_v15 = vpack.c.bf16 %v153_v14, %v149_v12  ;;  %v155_v16 = vpop.f32.mrb[3].mxu0  ;;  %v1715_v12 = vld [vmem:[#allocation2 + $0x2b0] ss:$24 sps:$4 sm:$0xff]   ;;  %v1718_v14 = vld [vmem:[#allocation2 + $0x2e0] ss:$24 sps:$4 sm:$0xff]  }
  0xf3   :  { %v1853_v17 = vpack.c.bf16 %v155_v16, %v151_v13  ;;  %v1720_v13 = vld [vmem:[#allocation2 + $0x2e4] ss:$24 sps:$4 sm:$0xff]  }
  0xf5   :  { %828 = vmatprep.mubr.bf16.mxu1 %v1853_v17  ;;  %921 = vmatprep.mubr.bf16.mxu0 %v1853_v17 }
  0xf6   :  { %829 = vmatmul.mubr.bf16.vlgmr.msra.gmra.mrb[0].mxu1 %v1851_v15  ;;  %922 = vmatmul.mubr.bf16.vlgmr.msra.gmra.mrb[24].mxu0 %v1851_v15 }
  0xf7   :  { %983 = vmatpush1.bf16.msra.mxu0 %v1673_v18  ;;  %1544 = vmatpush1.bf16.msra.mxu1 %v1673_v18  ;;  %v159_v20 = vpop.f32.mrb[4].mxu0 }
  0xf8   :  { %v161_v22 = vpop.f32.mrb[5].mxu0  ;;  %984 = vmatprep.subr.bf16.mxu0 %v1678_v19  ;;  %1529 = vmatprep.subr.bf16.mxu1 %v1678_v19 }
  0xf9   :  { %v163_v24 = vpop.f32.mrb[6].mxu0 }
  0xfa   :  { %v1859_v25 = vpack.c.bf16 %v163_v24, %v159_v20  ;;  %v165_v26 = vpop.f32.mrb[7].mxu0 }
  0xfb   :  { %v1861_v27 = vpack.c.bf16 %v165_v26, %v161_v22  ;;  %985 = vmatpush1.bf16.msra.mxu0 %v1676_v21  ;;  %1545 = vmatpush1.bf16.msra.mxu1 %v1676_v21 }
  0xfc   :  { %986 = vmatprep.subr.bf16.mxu0 %v1681_v23  ;;  %1530 = vmatprep.subr.bf16.mxu1 %v1681_v23 }
  0xfd   :  { %838 = vmatprep.mubr.bf16.mxu1 %v1861_v27  ;;  %931 = vmatprep.mubr.bf16.mxu0 %v1861_v27 }
  0xfe   :  { %839 = vmatmul.mubr.bf16.gmra.mrb[4].mxu1 %v1859_v25  ;;  %932 = vmatmul.mubr.bf16.gmra.mrb[28].mxu0 %v1859_v25 }
  0xff   :  { %987 = vmatpush1.bf16.msra.mxu0 %v1679_v28  ;;  %1546 = vmatpush1.bf16.msra.mxu1 %v1679_v28  ;;  %v169_v30 = vpop.f32.mrb[8].mxu0 }
 0x100   :  { %v171_v32 = vpop.f32.mrb[9].mxu0  ;;  %988 = vmatprep.subr.bf16.mxu0 %v1684_v29  ;;  %1531 = vmatprep.subr.bf16.mxu1 %v1684_v29 }
 0x101   :  { %v173_v34 = vpop.f32.mrb[10].mxu0 }
 0x102   :  { %v1867_v35 = vpack.c.bf16 %v173_v34, %v169_v30  ;;  %v175_v36 = vpop.f32.mrb[11].mxu0 }
 0x103   :  { %v1869_v37 = vpack.c.bf16 %v175_v36, %v171_v32  ;;  %989 = vmatpush1.bf16.msra.mxu0 %v1682_v31  ;;  %1547 = vmatpush1.bf16.msra.mxu1 %v1682_v31 }
 0x104   :  { %990 = vmatprep.subr.bf16.mxu0 %v1687_v33  ;;  %1532 = vmatprep.subr.bf16.mxu1 %v1687_v33 }
 0x105   :  { %848 = vmatprep.mubr.bf16.mxu1 %v1869_v37  ;;  %941 = vmatprep.mubr.bf16.mxu0 %v1869_v37 }
 0x106   :  { %849 = vmatmul.mubr.bf16.gmra.mrb[8].mxu1 %v1867_v35  ;;  %942 = vmatmul.mubr.bf16.gmra.mrb[32].mxu0 %v1867_v35 }
 0x107   :  { %991 = vmatpush1.bf16.msra.mxu0 %v1685_v38  ;;  %1548 = vmatpush1.bf16.msra.mxu1 %v1685_v38  ;;  %v179_v40 = vpop.f32.mrb[12].mxu0 }
 0x108   :  { %v181_v42 = vpop.f32.mrb[13].mxu0  ;;  %992 = vmatprep.subr.bf16.mxu0 %v1690_v39  ;;  %1533 = vmatprep.subr.bf16.mxu1 %v1690_v39 }
 0x109   :  { %v183_v44 = vpop.f32.mrb[14].mxu0 }
 0x10a   :  { %v1875_v45 = vpack.c.bf16 %v183_v44, %v179_v40  ;;  %v185_v46 = vpop.f32.mrb[15].mxu0 }
 0x10b   :  { %v1877_v47 = vpack.c.bf16 %v185_v46, %v181_v42  ;;  %993 = vmatpush1.bf16.msra.mxu0 %v1688_v41  ;;  %1549 = vmatpush1.bf16.msra.mxu1 %v1688_v41 }
 0x10c   :  { %994 = vmatprep.subr.bf16.mxu0 %v1693_v43  ;;  %1534 = vmatprep.subr.bf16.mxu1 %v1693_v43 }
 0x10d   :  { %858 = vmatprep.mubr.bf16.mxu1 %v1877_v47  ;;  %951 = vmatprep.mubr.bf16.mxu0 %v1877_v47 }
 0x10e   :  { %859 = vmatmul.mubr.bf16.gmra.mrb[12].mxu1 %v1875_v45  ;;  %952 = vmatmul.mubr.bf16.gmra.mrb[36].mxu0 %v1875_v45 }
 0x10f   :  { %995 = vmatpush1.bf16.msra.mxu0 %v1691_v48  ;;  %1550 = vmatpush1.bf16.msra.mxu1 %v1691_v48  ;;  %v189_v50 = vpop.f32.mrb[16].mxu0 }
 0x110   :  { %v191_v52 = vpop.f32.mrb[17].mxu0  ;;  %996 = vmatprep.subr.bf16.mxu0 %v1696_v49  ;;  %1535 = vmatprep.subr.bf16.mxu1 %v1696_v49 }
 0x111   :  { %v193_v54 = vpop.f32.mrb[18].mxu0 }
 0x112   :  { %v1883_v55 = vpack.c.bf16 %v193_v54, %v189_v50  ;;  %v195_v56 = vpop.f32.mrb[19].mxu0 }
 0x113   :  { %v1885_v57 = vpack.c.bf16 %v195_v56, %v191_v52  ;;  %997 = vmatpush1.bf16.msra.mxu0 %v1694_v51  ;;  %1551 = vmatpush1.bf16.msra.mxu1 %v1694_v51 }
 0x114   :  { %998 = vmatprep.subr.bf16.mxu0 %v1699_v53  ;;  %1536 = vmatprep.subr.bf16.mxu1 %v1699_v53 }
 0x115   :  { %868 = vmatprep.mubr.bf16.mxu1 %v1885_v57  ;;  %961 = vmatprep.mubr.bf16.mxu0 %v1885_v57 }
 0x116   :  { %869 = vmatmul.mubr.bf16.gmra.mrb[16].mxu1 %v1883_v55  ;;  %962 = vmatmul.mubr.bf16.gmra.mrb[40].mxu0 %v1883_v55 }
 0x117   :  { %999 = vmatpush1.bf16.msra.mxu0 %v1697_v58  ;;  %1552 = vmatpush1.bf16.msra.mxu1 %v1697_v58  ;;  %v199_v60 = vpop.f32.mrb[20].mxu0 }
 0x118   :  { %v201_v62 = vpop.f32.mrb[21].mxu0  ;;  %1000 = vmatprep.subr.bf16.mxu0 %v1702_v59  ;;  %1537 = vmatprep.subr.bf16.mxu1 %v1702_v59 }
 0x119   :  { %v203_v0 = vpop.f32.mrb[22].mxu0 }
 0x11a   :  { %v218_v1 = vpack.c.bf16 %v203_v0, %v199_v60  ;;  %v205_v2 = vpop.f32.mrb[23].mxu0 }
 0x11b   :  { %v219_v3 = vpack.c.bf16 %v205_v2, %v201_v62  ;;  %1001 = vmatpush1.bf16.msra.mxu0 %v1700_v61  ;;  %1553 = vmatpush1.bf16.msra.mxu1 %v1700_v61 }
 0x11c   :  { %1002 = vmatprep.subr.bf16.mxu0 %v1705_v63  ;;  %1538 = vmatprep.subr.bf16.mxu1 %v1705_v63 }
 0x11d   :  { %878 = vmatprep.mubr.bf16.mxu1 %v219_v3  ;;  %971 = vmatprep.mubr.bf16.mxu0 %v219_v3 }
 0x11e   :  { %879 = vmatmul.mubr.bf16.gmra.mrb[20].mxu1 %v218_v1  ;;  %972 = vmatmul.mubr.bf16.gmra.mrb[44].mxu0 %v218_v1 }
 0x11f   :  { %1003 = vmatpush1.bf16.msra.mxu0 %v1703_v4  ;;  %1554 = vmatpush1.bf16.msra.mxu1 %v1703_v4 }
 0x120   :  { %1014 = vmatprep.mubr.bf16.mxu0 %v1853_v17  ;;  %1034 = vmatprep.mubr.bf16.mxu1 %v1869_v37 }
 0x121   :  { %1004 = vmatprep.subr.bf16.mxu0 %v1708_v5  ;;  %1539 = vmatprep.subr.bf16.mxu1 %v1708_v5 }
 0x123   :  { %1005 = vmatpush1.bf16.msra.mxu0 %v1706_v6  ;;  %1555 = vmatpush1.bf16.msra.mxu1 %v1706_v6 }
 0x124   :  { %1006 = vmatprep.subr.bf16.mxu0 %v1711_v7  ;;  %1540 = vmatprep.subr.bf16.mxu1 %v1711_v7 }
 0x127   :  { %1007 = vmatpush1.bf16.msra.mxu0 %v1709_v8  ;;  %1556 = vmatpush1.bf16.msra.mxu1 %v1709_v8 }
 0x128   :  { %1008 = vmatprep.subr.bf16.mxu0 %v1714_v9  ;;  %1541 = vmatprep.subr.bf16.mxu1 %v1714_v9 }
 0x12b   :  { %1009 = vmatpush1.bf16.msra.mxu0 %v1712_v10  ;;  %1557 = vmatpush1.bf16.msra.mxu1 %v1712_v10 }
 0x12c   :  { %1010 = vmatprep.subr.bf16.mxu0 %v1717_v11  ;;  %1542 = vmatprep.subr.bf16.mxu1 %v1717_v11 }
 0x12f   :  { %1011 = vmatpush1.bf16.msra.mxu0 %v1715_v12  ;;  %1558 = vmatpush1.bf16.msra.mxu1 %v1715_v12 }
 0x130   :  { %1012 = vmatprep.subr.bf16.mxu0 %v1720_v13  ;;  %1543 = vmatprep.subr.bf16.mxu1 %v1720_v13 }
 0x133   :  { %1013 = vmatpush1.bf16.msra.mxu0 %v1718_v14  ;;  %1559 = vmatpush1.bf16.msra.mxu1 %v1718_v14 }
 0x136   :  { %1015 = vmatmul.mubr.bf16.vlgmr.msra.gmra.mrb[48].mxu0 %v1851_v15  ;;  %1035 = vmatmul.mubr.bf16.vlgmr.msra.gmra.mrb[24].mxu1 %v1867_v35 }
 0x137   :  { %1024 = vmatprep.mubr.bf16.mxu0 %v1861_v27  ;;  %1044 = vmatprep.mubr.bf16.mxu1 %v1877_v47 }
 0x13e   :  { %1025 = vmatmul.mubr.bf16.gmra.mrb[52].mxu0 %v1859_v25  ;;  %1045 = vmatmul.mubr.bf16.gmra.mrb[28].mxu1 %v1875_v45 }
 0x13f   :  { %1054 = vmatprep.mubr.bf16.mxu1 %v1885_v57 }
 0x146   :  { %1055 = vmatmul.mubr.bf16.gmra.mrb[32].mxu1 %v1883_v55 }
 0x147   :  { %1064 = vmatprep.mubr.bf16.mxu1 %v219_v3 }
 0x14e   :  { %1065 = vmatmul.mubr.bf16.gmra.mrb[36].mxu1 %v218_v1 }
 0x1c9   :  { %v830_v16 = vpop.f32.mrb[0].mxu1  ;;  %v923_v17 = vpop.f32.mrb[24].mxu0 }
 0x1ca   :  { %v832_v18 = vpop.f32.mrb[1].mxu1  ;;  %v925_v15 = vpop.f32.mrb[25].mxu0 }
 0x1cb   :  { %v1492_v19 = vpack.c.bf16 %v832_v18, %v830_v16  ;;  %v1493_v20 = vpack.c.bf16 %v925_v15, %v923_v17  ;;  %v834_v21 = vpop.f32.mrb[2].mxu1  ;;  %v927_v22 = vpop.f32.mrb[26].mxu0 }
 0x1cc   :  { %v836_v23 = vpop.f32.mrb[3].mxu1  ;;  %v929_v24 = vpop.f32.mrb[27].mxu0 }
 0x1cd   :  { %1291 = vst [vmem:[#allocation5] sm:$0xff] %v1492_v19  ;;  %1292 = vst [vmem:[#allocation5 + $0x8] sm:$0xff] %v1493_v20  ;;  %v1495_v25 = vpack.c.bf16 %v836_v23, %v834_v21  ;;  %v1496_v26 = vpack.c.bf16 %v929_v24, %v927_v22 }
 0x1cf   :  { %1294 = vst [vmem:[#allocation5 + $0x18] sm:$0xff] %v1495_v25  ;;  %1295 = vst [vmem:[#allocation5 + $0x20] sm:$0xff] %v1496_v26 }
 0x1d1   :  { %v840_v27 = vpop.f32.mrb[4].mxu1  ;;  %v933_v28 = vpop.f32.mrb[28].mxu0 }
 0x1d2   :  { %v842_v29 = vpop.f32.mrb[5].mxu1  ;;  %v935_v30 = vpop.f32.mrb[29].mxu0 }
 0x1d3   :  { %v1498_v31 = vpack.c.bf16 %v842_v29, %v840_v27  ;;  %v1499_v32 = vpack.c.bf16 %v935_v30, %v933_v28  ;;  %v844_v33 = vpop.f32.mrb[6].mxu1  ;;  %v937_v34 = vpop.f32.mrb[30].mxu0 }
 0x1d4   :  { %v846_v35 = vpop.f32.mrb[7].mxu1  ;;  %v939_v36 = vpop.f32.mrb[31].mxu0 }
 0x1d5   :  { %1297 = vst [vmem:[#allocation5 + $0x30] sm:$0xff] %v1498_v31  ;;  %1298 = vst [vmem:[#allocation5 + $0x38] sm:$0xff] %v1499_v32  ;;  %v1501_v37 = vpack.c.bf16 %v846_v35, %v844_v33  ;;  %v1502_v38 = vpack.c.bf16 %v939_v36, %v937_v34 }
 0x1d7   :  { %1300 = vst [vmem:[#allocation5 + $0x48] sm:$0xff] %v1501_v37  ;;  %1301 = vst [vmem:[#allocation5 + $0x50] sm:$0xff] %v1502_v38 }
 0x1d9   :  { %v850_v39 = vpop.f32.mrb[8].mxu1  ;;  %v943_v40 = vpop.f32.mrb[32].mxu0 }
 0x1da   :  { %v852_v41 = vpop.f32.mrb[9].mxu1  ;;  %v945_v42 = vpop.f32.mrb[33].mxu0 }
 0x1db   :  { %v1504_v43 = vpack.c.bf16 %v852_v41, %v850_v39  ;;  %v1505_v44 = vpack.c.bf16 %v945_v42, %v943_v40  ;;  %v854_v45 = vpop.f32.mrb[10].mxu1  ;;  %v947_v46 = vpop.f32.mrb[34].mxu0 }
 0x1dc   :  { %v856_v47 = vpop.f32.mrb[11].mxu1  ;;  %v949_v48 = vpop.f32.mrb[35].mxu0 }
 0x1dd   :  { %1303 = vst [vmem:[#allocation5 + $0x60] sm:$0xff] %v1504_v43  ;;  %1304 = vst [vmem:[#allocation5 + $0x68] sm:$0xff] %v1505_v44  ;;  %v1507_v49 = vpack.c.bf16 %v856_v47, %v854_v45  ;;  %v1508_v50 = vpack.c.bf16 %v949_v48, %v947_v46 }
 0x1df   :  { %1306 = vst [vmem:[#allocation5 + $0x78] sm:$0xff] %v1507_v49  ;;  %1307 = vst [vmem:[#allocation5 + $0x80] sm:$0xff] %v1508_v50 }
 0x1e1   :  { %v860_v51 = vpop.f32.mrb[12].mxu1  ;;  %v953_v52 = vpop.f32.mrb[36].mxu0 }
 0x1e2   :  { %v862_v53 = vpop.f32.mrb[13].mxu1  ;;  %v955_v54 = vpop.f32.mrb[37].mxu0 }
 0x1e3   :  { %v1510_v55 = vpack.c.bf16 %v862_v53, %v860_v51  ;;  %v1511_v56 = vpack.c.bf16 %v955_v54, %v953_v52  ;;  %v864_v57 = vpop.f32.mrb[14].mxu1  ;;  %v957_v58 = vpop.f32.mrb[38].mxu0 }
 0x1e4   :  { %v866_v59 = vpop.f32.mrb[15].mxu1  ;;  %v959_v60 = vpop.f32.mrb[39].mxu0 }
 0x1e5   :  { %1309 = vst [vmem:[#allocation5 + $0x90] sm:$0xff] %v1510_v55  ;;  %1310 = vst [vmem:[#allocation5 + $0x98] sm:$0xff] %v1511_v56  ;;  %v1513_v61 = vpack.c.bf16 %v866_v59, %v864_v57  ;;  %v1514_v62 = vpack.c.bf16 %v959_v60, %v957_v58 }
 0x1e7   :  { %1312 = vst [vmem:[#allocation5 + $0xa8] sm:$0xff] %v1513_v61  ;;  %1313 = vst [vmem:[#allocation5 + $0xb0] sm:$0xff] %v1514_v62 }
 0x1e9   :  { %v870_v63 = vpop.f32.mrb[16].mxu1  ;;  %v963_v0 = vpop.f32.mrb[40].mxu0 }
 0x1ea   :  { %v872_v1 = vpop.f32.mrb[17].mxu1  ;;  %v965_v2 = vpop.f32.mrb[41].mxu0 }
 0x1eb   :  { %v1516_v3 = vpack.c.bf16 %v872_v1, %v870_v63  ;;  %v1517_v4 = vpack.c.bf16 %v965_v2, %v963_v0  ;;  %v874_v5 = vpop.f32.mrb[18].mxu1  ;;  %v967_v6 = vpop.f32.mrb[42].mxu0 }
 0x1ec   :  { %v876_v7 = vpop.f32.mrb[19].mxu1  ;;  %v969_v8 = vpop.f32.mrb[43].mxu0 }
 0x1ed   :  { %1315 = vst [vmem:[#allocation5 + $0xc0] sm:$0xff] %v1516_v3  ;;  %1316 = vst [vmem:[#allocation5 + $0xc8] sm:$0xff] %v1517_v4  ;;  %v1519_v9 = vpack.c.bf16 %v876_v7, %v874_v5  ;;  %v1520_v10 = vpack.c.bf16 %v969_v8, %v967_v6 }
 0x1ef   :  { %1318 = vst [vmem:[#allocation5 + $0xd8] sm:$0xff] %v1519_v9  ;;  %1319 = vst [vmem:[#allocation5 + $0xe0] sm:$0xff] %v1520_v10 }
 0x1f1   :  { %v880_v11 = vpop.f32.mrb[20].mxu1  ;;  %v973_v12 = vpop.f32.mrb[44].mxu0 }
 0x1f2   :  { %v882_v13 = vpop.f32.mrb[21].mxu1  ;;  %v975_v14 = vpop.f32.mrb[45].mxu0 }
 0x1f3   :  { %v1522_v16 = vpack.c.bf16 %v882_v13, %v880_v11  ;;  %v1523_v17 = vpack.c.bf16 %v975_v14, %v973_v12  ;;  %v884_v18 = vpop.f32.mrb[22].mxu1  ;;  %v977_v15 = vpop.f32.mrb[46].mxu0 }
 0x1f4   :  { %v886_v19 = vpop.f32.mrb[23].mxu1  ;;  %v979_v20 = vpop.f32.mrb[47].mxu0 }
 0x1f5   :  { %1321 = vst [vmem:[#allocation5 + $0xf0] sm:$0xff] %v1522_v16  ;;  %1322 = vst [vmem:[#allocation5 + $0xf8] sm:$0xff] %v1523_v17  ;;  %v1525_v21 = vpack.c.bf16 %v886_v19, %v884_v18  ;;  %v1526_v22 = vpack.c.bf16 %v979_v20, %v977_v15 }
 0x1f7   :  { %1324 = vst [vmem:[#allocation5 + $0x108] sm:$0xff] %v1525_v21  ;;  %1325 = vst [vmem:[#allocation5 + $0x110] sm:$0xff] %v1526_v22 }
 0x209   :  { %v1016_v23 = vpop.f32.mrb[48].mxu0  ;;  %v1036_v24 = vpop.f32.mrb[24].mxu1 }
 0x20a   :  { %v1018_v25 = vpop.f32.mrb[49].mxu0  ;;  %v1038_v26 = vpop.f32.mrb[25].mxu1 }
 0x20b   :  { %v1494_v27 = vpack.c.bf16 %v1018_v25, %v1016_v23  ;;  %v1506_v28 = vpack.c.bf16 %v1038_v26, %v1036_v24  ;;  %v1020_v29 = vpop.f32.mrb[50].mxu0  ;;  %v1040_v30 = vpop.f32.mrb[26].mxu1 }
 0x20c   :  { %v1022_v31 = vpop.f32.mrb[51].mxu0  ;;  %v1042_v32 = vpop.f32.mrb[27].mxu1 }
 0x20d   :  { %1293 = vst [vmem:[#allocation5 + $0x10] sm:$0xff] %v1494_v27  ;;  %1305 = vst [vmem:[#allocation5 + $0x70] sm:$0xff] %v1506_v28  ;;  %v1497_v33 = vpack.c.bf16 %v1022_v31, %v1020_v29  ;;  %v1509_v34 = vpack.c.bf16 %v1042_v32, %v1040_v30 }
 0x20f   :  { %1296 = vst [vmem:[#allocation5 + $0x28] sm:$0xff] %v1497_v33  ;;  %1308 = vst [vmem:[#allocation5 + $0x88] sm:$0xff] %v1509_v34 }
 0x211   :  { %v1026_v35 = vpop.f32.mrb[52].mxu0  ;;  %v1046_v36 = vpop.f32.mrb[28].mxu1 }
 0x212   :  { %v1028_v37 = vpop.f32.mrb[53].mxu0  ;;  %v1048_v38 = vpop.f32.mrb[29].mxu1 }
 0x213   :  { %v1500_v39 = vpack.c.bf16 %v1028_v37, %v1026_v35  ;;  %v1512_v40 = vpack.c.bf16 %v1048_v38, %v1046_v36  ;;  %v1030_v41 = vpop.f32.mrb[54].mxu0  ;;  %v1050_v42 = vpop.f32.mrb[30].mxu1 }
 0x214   :  { %v1032_v43 = vpop.f32.mrb[55].mxu0  ;;  %v1052_v44 = vpop.f32.mrb[31].mxu1 }
 0x215   :  { %1299 = vst [vmem:[#allocation5 + $0x40] sm:$0xff] %v1500_v39  ;;  %1311 = vst [vmem:[#allocation5 + $0xa0] sm:$0xff] %v1512_v40  ;;  %v1503_v45 = vpack.c.bf16 %v1032_v43, %v1030_v41  ;;  %v1515_v46 = vpack.c.bf16 %v1052_v44, %v1050_v42 }
 0x217   :  { %1302 = vst [vmem:[#allocation5 + $0x58] sm:$0xff] %v1503_v45  ;;  %1314 = vst [vmem:[#allocation5 + $0xb8] sm:$0xff] %v1515_v46 }
 0x219   :  { %v1056_v47 = vpop.f32.mrb[32].mxu1 }
 0x21a   :  { %v1058_v48 = vpop.f32.mrb[33].mxu1 }
 0x21b   :  { %v1518_v49 = vpack.c.bf16 %v1058_v48, %v1056_v47  ;;  %v1060_v50 = vpop.f32.mrb[34].mxu1 }
 0x21c   :  { %v1062_v51 = vpop.f32.mrb[35].mxu1 }
 0x21d   :  { %1317 = vst [vmem:[#allocation5 + $0xd0] sm:$0xff] %v1518_v49  ;;  %v1521_v52 = vpack.c.bf16 %v1062_v51, %v1060_v50 }
 0x21f   :  { %1320 = vst [vmem:[#allocation5 + $0xe8] sm:$0xff] %v1521_v52 }
 0x221   :  { %v1066_v53 = vpop.f32.mrb[36].mxu1 }
 0x222   :  { %v1068_v54 = vpop.f32.mrb[37].mxu1 }
 0x223   :  { %v1524_v55 = vpack.c.bf16 %v1068_v54, %v1066_v53  ;;  %v1070_v56 = vpop.f32.mrb[38].mxu1 }
 0x224   :  { %v1072_v57 = vpop.f32.mrb[39].mxu1 }
 0x225   :  { %1323 = vst [vmem:[#allocation5 + $0x100] sm:$0xff] %v1524_v55  ;;  %v1527_v58 = vpack.c.bf16 %v1072_v57, %v1070_v56 }
 0x227   :  { %1326 = vst [vmem:[#allocation5 + $0x118] sm:$0xff] %v1527_v58 }
 0x228   :  { %1754 = shalt.err (!%p1751_p12)
}
 0x229   :  { %s1755_s21 = scalar_lea.hbm %s1919_s3, 4608 }
 0x22a   :  { %p1756_p13 = scmp.ne.s32.totalorder %s1919_s3, %s1755_s21  ;;  %p1759_p0 = scmp.lt.u32.totalorder %s1755_s21, %s1919_s3 }
 0x22c   :  { %p1761_p1 = pnand %p1759_p0, %p1756_p13 }
 0x22e   :  { %1764 = shalt.err (!%p1761_p1)
}
 0x22f   :  { %1338 = dma.vmem_to_hbm [thread:$0]  %s1333_s17, 4608, %s1919_s3, [#allocation4], %s1770_s22, %s1770_s22, %s1771_s23  }
 0x230   :  { %1767 = dma.done.wait [#allocation4], 4608  }
 0x231   :  { %1768 = vsyncadd [#allocation4], 4294962688 }
 0x232   :  { %1342 = vsyncpa [#allocation3], 1 }
 0x233   :  { %1343 = vsyncpa [#allocation4], 1 }

</bundles_post_ra>
